<compile_context>
chip_gen: v6e
topology: v6e:2x2x1
jax: 0.10.0
libtpu: 0.0.40
codegen_flags: <defaults>
</compile_context>

<pallas_src>
import functools

import jax
import jax.numpy as jnp
import numpy as np
from jax import lax
from jax.experimental import pallas as pl
from jax.experimental.pallas import tpu as pltpu


# ----------------------------- Pallas kernel ------------------------------- #
def _pairwise_loss_kernel(fs_ref, ft_ref, o_ref, ps_buf, pt_buf, gs_acc, gt_acc,
                          *, kh, kw, out_h, out_w, inv_denom):
    """Fused ceil-mode max-pool + pairwise-similarity loss, one batch element.

    fs_ref, ft_ref : (tc, H, W) channel tile of the student / teacher map
    o_ref          : (1, 8, 128) per-batch partial sum (lane-dense, replicated)
    ps_buf, pt_buf : (M, tc) pooled student / teacher scratch (f32, channels
                     lane-dense)
    gs_acc, gt_acc : (M, M) Gram accumulators across channel tiles (f32)
    """
    c_idx = pl.program_id(1)

    @pl.when(c_idx == 0)
    def _init():
        gs_acc[...] = jnp.zeros_like(gs_acc)
        gt_acc[...] = jnp.zeros_like(gt_acc)

    tc, H, W = fs_ref.shape

    # Ceil-mode MaxPool2d(kernel=(kh,kw), stride=(kh,kw), padding=0): one
    # (possibly clipped) window per output position, reduced spatially and
    # stored as a row of the pooled scratch.  Max-pool commutes with the later
    # f32 cast, so pooling runs in the native dtype.
    def pool_into(src_ref, dst_buf):
        for oh in range(out_h):
            h0 = oh * kh
            h1 = min(h0 + kh, H)            # ceil_mode: clip the last window
            for ow in range(out_w):
                w0 = ow * kw
                w1 = min(w0 + kw, W)
                win = src_ref[:, h0:h1, w0:w1]                   # (tc, wh, ww)
                wmax = jnp.max(jnp.max(win, axis=2), axis=1)     # (tc,)
                dst_buf[oh * out_w + ow, :] = wmax.astype(jnp.float32)

    pool_into(fs_ref, ps_buf)
    pool_into(ft_ref, pt_buf)

    # Raw spatial Gram for this channel tile: G += P @ P^T (contract channels).
    ps = ps_buf[...]                     # (M, tc) f32
    pt = pt_buf[...]
    dn = (((1,), (1,)), ((), ()))
    gs_acc[...] += lax.dot_general(ps, ps, dn, preferred_element_type=jnp.float32)
    gt_acc[...] += lax.dot_general(pt, pt, dn, preferred_element_type=jnp.float32)

    @pl.when(c_idx == pl.num_programs(1) - 1)
    def _finalize():
        gs = gs_acc[...]
        gt = gt_acc[...]
        m = gs.shape[0]
        eye = (lax.broadcasted_iota(jnp.int32, (m, m), 0)
               == lax.broadcasted_iota(jnp.int32, (m, m), 1)).astype(jnp.float32)
        # Channel L2 norms come for free as the accumulated Gram diagonal:
        # diag(G)[p] = sum_c f[c, p]^2.  Normalization is folded into a
        # post-matmul (M, M) scale:  (f/n)^T (f/n) == (f^T f) * (1/n)(1/n)^T,
        # with eps semantics 1 / (sqrt(sum) + 1e-8) matching the reference.
        inv_ns = 1.0 / (jnp.sqrt(jnp.sum(gs * eye, axis=1)) + 1e-8)   # (M,)
        inv_nt = 1.0 / (jnp.sqrt(jnp.sum(gt * eye, axis=1)) + 1e-8)
        sim_s = gs * inv_ns[:, None] * inv_ns[None, :]
        sim_t = gt * inv_nt[:, None] * inv_nt[None, :]
        diff = sim_t - sim_s
        partial = (jnp.sum(diff * diff) * inv_denom).astype(jnp.float32)
        o_ref[...] = jnp.broadcast_to(partial.reshape(1, 1, 1), o_ref.shape)


# ------------------------------- Wrapper ------------------------------------ #
def _pairwise_pool_sim_loss(feat_s, feat_t, kh, kw):
    """feat_s / feat_t: (B, C, H, W) -> scalar loss (f32)."""
    B, Ct, H, W = feat_t.shape
    Bs, Cs, Hs, Ws = feat_s.shape
    assert (B, H, W) == (Bs, Hs, Ws), "student/teacher batch+spatial must match"

    # Different channel counts are allowed by the math (zero channels add
    # nothing to the Gram or the norms), so pad the smaller one.
    C = max(Cs, Ct)
    if Cs != C:
        feat_s = jnp.pad(feat_s, ((0, 0), (0, C - Cs), (0, 0), (0, 0)))
    if Ct != C:
        feat_t = jnp.pad(feat_t, ((0, 0), (0, C - Ct), (0, 0), (0, 0)))

    out_h = -(-H // kh)
    out_w = -(-W // kw)
    M = out_h * out_w
    # sim_err = diff^2 / (out_w*out_h)^2 / B, summed over everything.
    inv_denom = 1.0 / (float(M) ** 2 * float(B))

    # Channel tile: largest divisor of C whose (2 tensors x 2 pipeline buffers)
    # input blocks stay within a conservative VMEM budget (safe under every
    # chip's default scoped-VMEM limit).
    bytes_per_chan = 2 * H * W * (jnp.dtype(feat_s.dtype).itemsize
                                  + jnp.dtype(feat_t.dtype).itemsize)
    budget = 8 * 1024 * 1024
    cap = max(1, budget // bytes_per_chan)
    if cap >= C:
        tc = C
    else:
        tc = max(d for d in range(1, C + 1) if C % d == 0 and d <= cap)
    nc = C // tc
    # TODO(synk): spatial tiling for the (rare) case where even a
    # single-channel (H, W) plane exceeds the VMEM budget.

    kernel = functools.partial(_pairwise_loss_kernel, kh=kh, kw=kw,
                               out_h=out_h, out_w=out_w, inv_denom=inv_denom)

    partials = pl.pallas_call(
        kernel,
        out_shape=jax.ShapeDtypeStruct((B, 8, 128), jnp.float32),
        grid_spec=pltpu.PrefetchScalarGridSpec(
            num_scalar_prefetch=0,
            grid=(B, nc),
            in_specs=[
                pl.BlockSpec((None, tc, H, W), lambda b, c: (b, c, 0, 0)),
                pl.BlockSpec((None, tc, H, W), lambda b, c: (b, c, 0, 0)),
            ],
            out_specs=pl.BlockSpec((1, 8, 128), lambda b, c: (b, 0, 0)),
            scratch_shapes=[
                pltpu.VMEM((M, tc), jnp.float32),   # pooled student
                pltpu.VMEM((M, tc), jnp.float32),   # pooled teacher
                pltpu.VMEM((M, M), jnp.float32),    # Gram acc student
                pltpu.VMEM((M, M), jnp.float32),    # Gram acc teacher
            ],
        ),
        compiler_params=pltpu.CompilerParams(
            # Per-batch partial sums -> the batch axis can shard across
            # TensorCores; the channel axis carries the Gram accumulators.
            dimension_semantics=("parallel", "arbitrary"),
        ),
    )(feat_s, feat_t)
    return jnp.sum(partials[:, 0, 0])


def criterion_pairwise_for_whole_feat_after_pool(preds_S, preds_T, *, scale, feat_ind):
    """Forward pass of CriterionPairWiseforWholeFeatAfterPool."""
    feat_S = preds_S[feat_ind]
    feat_T = preds_T[feat_ind]  # .detach() is a no-op for the forward pass

    # Matches the PyTorch module verbatim: shape[2]/shape[3] are named (w, h)
    # there and used as MaxPool2d kernel_size=(patch_w, patch_h) over (H, W).
    total_w, total_h = feat_T.shape[2], feat_T.shape[3]
    patch_w, patch_h = int(total_w * scale), int(total_h * scale)
    return _pairwise_pool_sim_loss(feat_S, feat_T, patch_w, patch_h)


# ------------------------------ Reference ----------------------------------- #
def _maxpool2d_ceil(x, kh, kw):
    """MaxPool2d(kernel=(kh,kw), stride=(kh,kw), padding=0, ceil_mode=True), NCHW."""
    B, C, H, W = x.shape
    out_h = -(-H // kh)
    out_w = -(-W // kw)
    pad_h = out_h * kh - H
    pad_w = out_w * kw - W
    init = jnp.array(-jnp.inf, dtype=x.dtype)
    return lax.reduce_window(
        x, init, lax.max,
        window_dimensions=(1, 1, kh, kw),
        window_strides=(1, 1, kh, kw),
        padding=((0, 0), (0, 0), (0, pad_h), (0, pad_w)),
    )


def _ref_loss(pooled_s, pooled_t):
    def sim(f):
        f = f.astype(jnp.float32)
        n = jnp.sqrt(jnp.sum(f ** 2, axis=1, keepdims=True)) + 1e-8
        f = f / n
        f = f.reshape(f.shape[0], f.shape[1], -1)
        return jnp.einsum("icm,icn->imn", f, f)

    denom = (pooled_t.shape[-1] * pooled_t.shape[-2]) ** 2 * pooled_t.shape[0]
    return jnp.sum((sim(pooled_t) - sim(pooled_s)) ** 2) / denom


if __name__ == "__main__":
    key = jax.random.PRNGKey(0)
    k1, k2, k3, k4 = jax.random.split(key, 4)

    B, C, H, W = 2, 4, 16, 16
    scale = 0.5      # -> 8x8 pooling windows -> pooled 2x2 -> M = 4
    feat_ind = 1

    # preds_S / preds_T are lists of feature maps; the module indexes feat_ind.
    preds_S = [
        jax.random.normal(k1, (B, C, H, W), dtype=jnp.float32),
        jax.random.normal(k2, (B, C, H, W), dtype=jnp.float32),
    ]
    preds_T = [
        jax.random.normal(k3, (B, C, H, W), dtype=jnp.float32),
        jax.random.normal(k4, (B, C, H, W), dtype=jnp.float32),
    ]

    loss = criterion_pairwise_for_whole_feat_after_pool(
        preds_S, preds_T, scale=scale, feat_ind=feat_ind
    )
    loss = jax.block_until_ready(loss)

    # Pure-JAX reference of the same math for a correctness check.
    fS = preds_S[feat_ind]
    fT = preds_T[feat_ind]
    kh, kw = int(fT.shape[2] * scale), int(fT.shape[3] * scale)
    ref = _ref_loss(_maxpool2d_ceil(fS, kh, kw), _maxpool2d_ceil(fT, kh, kw))
    ref = jax.block_until_ready(ref)

    np.testing.assert_allclose(np.asarray(loss), np.asarray(ref), rtol=1e-5, atol=1e-6)
    print("KERNEL_OK")
</pallas_src>

<mosaic_0001>
module attributes {stable_mosaic.version = 11 : i64} {
  func.func @_pairwise_loss_kernel(%arg0: i32, %arg1: i32, %arg2: memref<1x4x16x16xf32, #tpu.memory_space<vmem>>, %arg3: memref<1x4x16x16xf32, #tpu.memory_space<vmem>>, %arg4: memref<1x8x128xf32, #tpu.memory_space<vmem>>, %arg5: memref<4x4xf32, #tpu.memory_space<vmem>>, %arg6: memref<4x4xf32, #tpu.memory_space<vmem>>, %arg7: memref<4x4xf32, #tpu.memory_space<vmem>>, %arg8: memref<4x4xf32, #tpu.memory_space<vmem>>) attributes {dimension_semantics = [#tpu.dimension_semantics<parallel>, #tpu.dimension_semantics<arbitrary>], iteration_bounds = array<i64: 2, 1>, scalar_prefetch = 0 : i64, scratch_operands = 4 : i64, tpu.core_type = #tpu.core_type<tc>, window_params = [{transform_indices = @transform_0, window_bounds = array<i64: 1, 4, 16, 16>}, {transform_indices = @transform_1, window_bounds = array<i64: 1, 4, 16, 16>}, {transform_indices = @transform_2, window_bounds = array<i64: 1, 8, 128>}]} {
    %c0_i32 = arith.constant 0 : i32
    %0 = arith.cmpi eq, %arg1, %c0_i32 : i32
    %1 = arith.extui %0 : i1 to i32
    %c0_i32_0 = arith.constant 0 : i32
    %2 = arith.cmpi ne, %1, %c0_i32_0 : i32
    scf.if %2 {
      %cst_75 = arith.constant 0.000000e+00 : f32
      %72 = vector.broadcast %cst_75 : f32 to vector<4x4xf32>
      %c0_76 = arith.constant 0 : index
      %c0_77 = arith.constant 0 : index
      %73 = vector.load %arg7[%c0_76, %c0_77] : memref<4x4xf32, #tpu.memory_space<vmem>>, vector<4x4xf32>
      tpu.vector_store %arg7[%c0_76, %c0_77], %72 {strides = array<i32>} : memref<4x4xf32, #tpu.memory_space<vmem>>, vector<4x4xf32>,
      %cst_78 = arith.constant 0.000000e+00 : f32
      %74 = vector.broadcast %cst_78 : f32 to vector<4x4xf32>
      %c0_79 = arith.constant 0 : index
      %c0_80 = arith.constant 0 : index
      %75 = vector.load %arg8[%c0_79, %c0_80] : memref<4x4xf32, #tpu.memory_space<vmem>>, vector<4x4xf32>
      tpu.vector_store %arg8[%c0_79, %c0_80], %74 {strides = array<i32>} : memref<4x4xf32, #tpu.memory_space<vmem>>, vector<4x4xf32>,
    } else {
    }
    %c0 = arith.constant 0 : index
    %c0_1 = arith.constant 0 : index
    %c0_2 = arith.constant 0 : index
    %c0_3 = arith.constant 0 : index
    %3 = vector.load %arg2[%c0, %c0_1, %c0_2, %c0_3] : memref<1x4x16x16xf32, #tpu.memory_space<vmem>>, vector<1x4x8x8xf32>
    %4 = vector.shape_cast %3 : vector<1x4x8x8xf32> to vector<4x8x8xf32>
    %cst = arith.constant dense<0xFF800000> : vector<4x8xf32>
    %5 = vector.multi_reduction <maximumf>, %4, %cst [2] : vector<4x8x8xf32> to vector<4x8xf32>
    %cst_4 = arith.constant dense<0xFF800000> : vector<4xf32>
    %6 = vector.multi_reduction <maximumf>, %5, %cst_4 [1] : vector<4x8xf32> to vector<4xf32>
    %c0_5 = arith.constant 0 : index
    %c0_6 = arith.constant 0 : index
    %7 = vector.load %arg5[%c0_5, %c0_6] : memref<4x4xf32, #tpu.memory_space<vmem>>, vector<1x4xf32>
    %8 = vector.shape_cast %7 : vector<1x4xf32> to vector<4xf32>
    %9 = vector.shape_cast %6 : vector<4xf32> to vector<1x4xf32>
    tpu.vector_store %arg5[%c0_5, %c0_6], %9 {strides = array<i32>} : memref<4x4xf32, #tpu.memory_space<vmem>>, vector<1x4xf32>,
    %c0_7 = arith.constant 0 : index
    %c0_8 = arith.constant 0 : index
    %c0_9 = arith.constant 0 : index
    %c8 = arith.constant 8 : index
    %10 = vector.load %arg2[%c0_7, %c0_8, %c0_9, %c8] : memref<1x4x16x16xf32, #tpu.memory_space<vmem>>, vector<1x4x8x8xf32>
    %11 = vector.shape_cast %10 : vector<1x4x8x8xf32> to vector<4x8x8xf32>
    %cst_10 = arith.constant dense<0xFF800000> : vector<4x8xf32>
    %12 = vector.multi_reduction <maximumf>, %11, %cst_10 [2] : vector<4x8x8xf32> to vector<4x8xf32>
    %cst_11 = arith.constant dense<0xFF800000> : vector<4xf32>
    %13 = vector.multi_reduction <maximumf>, %12, %cst_11 [1] : vector<4x8xf32> to vector<4xf32>
    %c1 = arith.constant 1 : index
    %c0_12 = arith.constant 0 : index
    %14 = vector.load %arg5[%c1, %c0_12] : memref<4x4xf32, #tpu.memory_space<vmem>>, vector<1x4xf32>
    %15 = vector.shape_cast %14 : vector<1x4xf32> to vector<4xf32>
    %16 = vector.shape_cast %13 : vector<4xf32> to vector<1x4xf32>
    tpu.vector_store %arg5[%c1, %c0_12], %16 {strides = array<i32>} : memref<4x4xf32, #tpu.memory_space<vmem>>, vector<1x4xf32>,
    %c0_13 = arith.constant 0 : index
    %c0_14 = arith.constant 0 : index
    %c8_15 = arith.constant 8 : index
    %c0_16 = arith.constant 0 : index
    %17 = vector.load %arg2[%c0_13, %c0_14, %c8_15, %c0_16] : memref<1x4x16x16xf32, #tpu.memory_space<vmem>>, vector<1x4x8x8xf32>
    %18 = vector.shape_cast %17 : vector<1x4x8x8xf32> to vector<4x8x8xf32>
    %cst_17 = arith.constant dense<0xFF800000> : vector<4x8xf32>
    %19 = vector.multi_reduction <maximumf>, %18, %cst_17 [2] : vector<4x8x8xf32> to vector<4x8xf32>
    %cst_18 = arith.constant dense<0xFF800000> : vector<4xf32>
    %20 = vector.multi_reduction <maximumf>, %19, %cst_18 [1] : vector<4x8xf32> to vector<4xf32>
    %c2 = arith.constant 2 : index
    %c0_19 = arith.constant 0 : index
    %21 = vector.load %arg5[%c2, %c0_19] : memref<4x4xf32, #tpu.memory_space<vmem>>, vector<1x4xf32>
    %22 = vector.shape_cast %21 : vector<1x4xf32> to vector<4xf32>
    %23 = vector.shape_cast %20 : vector<4xf32> to vector<1x4xf32>
    tpu.vector_store %arg5[%c2, %c0_19], %23 {strides = array<i32>} : memref<4x4xf32, #tpu.memory_space<vmem>>, vector<1x4xf32>,
    %c0_20 = arith.constant 0 : index
    %c0_21 = arith.constant 0 : index
    %c8_22 = arith.constant 8 : index
    %c8_23 = arith.constant 8 : index
    %24 = vector.load %arg2[%c0_20, %c0_21, %c8_22, %c8_23] : memref<1x4x16x16xf32, #tpu.memory_space<vmem>>, vector<1x4x8x8xf32>
    %25 = vector.shape_cast %24 : vector<1x4x8x8xf32> to vector<4x8x8xf32>
    %cst_24 = arith.constant dense<0xFF800000> : vector<4x8xf32>
    %26 = vector.multi_reduction <maximumf>, %25, %cst_24 [2] : vector<4x8x8xf32> to vector<4x8xf32>
    %cst_25 = arith.constant dense<0xFF800000> : vector<4xf32>
    %27 = vector.multi_reduction <maximumf>, %26, %cst_25 [1] : vector<4x8xf32> to vector<4xf32>
    %c3 = arith.constant 3 : index
    %c0_26 = arith.constant 0 : index
    %28 = vector.load %arg5[%c3, %c0_26] : memref<4x4xf32, #tpu.memory_space<vmem>>, vector<1x4xf32>
    %29 = vector.shape_cast %28 : vector<1x4xf32> to vector<4xf32>
    %30 = vector.shape_cast %27 : vector<4xf32> to vector<1x4xf32>
    tpu.vector_store %arg5[%c3, %c0_26], %30 {strides = array<i32>} : memref<4x4xf32, #tpu.memory_space<vmem>>, vector<1x4xf32>,
    %c0_27 = arith.constant 0 : index
    %c0_28 = arith.constant 0 : index
    %c0_29 = arith.constant 0 : index
    %c0_30 = arith.constant 0 : index
    %31 = vector.load %arg3[%c0_27, %c0_28, %c0_29, %c0_30] : memref<1x4x16x16xf32, #tpu.memory_space<vmem>>, vector<1x4x8x8xf32>
    %32 = vector.shape_cast %31 : vector<1x4x8x8xf32> to vector<4x8x8xf32>
    %cst_31 = arith.constant dense<0xFF800000> : vector<4x8xf32>
    %33 = vector.multi_reduction <maximumf>, %32, %cst_31 [2] : vector<4x8x8xf32> to vector<4x8xf32>
    %cst_32 = arith.constant dense<0xFF800000> : vector<4xf32>
    %34 = vector.multi_reduction <maximumf>, %33, %cst_32 [1] : vector<4x8xf32> to vector<4xf32>
    %c0_33 = arith.constant 0 : index
    %c0_34 = arith.constant 0 : index
    %35 = vector.load %arg6[%c0_33, %c0_34] : memref<4x4xf32, #tpu.memory_space<vmem>>, vector<1x4xf32>
    %36 = vector.shape_cast %35 : vector<1x4xf32> to vector<4xf32>
    %37 = vector.shape_cast %34 : vector<4xf32> to vector<1x4xf32>
    tpu.vector_store %arg6[%c0_33, %c0_34], %37 {strides = array<i32>} : memref<4x4xf32, #tpu.memory_space<vmem>>, vector<1x4xf32>,
    %c0_35 = arith.constant 0 : index
    %c0_36 = arith.constant 0 : index
    %c0_37 = arith.constant 0 : index
    %c8_38 = arith.constant 8 : index
    %38 = vector.load %arg3[%c0_35, %c0_36, %c0_37, %c8_38] : memref<1x4x16x16xf32, #tpu.memory_space<vmem>>, vector<1x4x8x8xf32>
    %39 = vector.shape_cast %38 : vector<1x4x8x8xf32> to vector<4x8x8xf32>
    %cst_39 = arith.constant dense<0xFF800000> : vector<4x8xf32>
    %40 = vector.multi_reduction <maximumf>, %39, %cst_39 [2] : vector<4x8x8xf32> to vector<4x8xf32>
    %cst_40 = arith.constant dense<0xFF800000> : vector<4xf32>
    %41 = vector.multi_reduction <maximumf>, %40, %cst_40 [1] : vector<4x8xf32> to vector<4xf32>
    %c1_41 = arith.constant 1 : index
    %c0_42 = arith.constant 0 : index
    %42 = vector.load %arg6[%c1_41, %c0_42] : memref<4x4xf32, #tpu.memory_space<vmem>>, vector<1x4xf32>
    %43 = vector.shape_cast %42 : vector<1x4xf32> to vector<4xf32>
    %44 = vector.shape_cast %41 : vector<4xf32> to vector<1x4xf32>
    tpu.vector_store %arg6[%c1_41, %c0_42], %44 {strides = array<i32>} : memref<4x4xf32, #tpu.memory_space<vmem>>, vector<1x4xf32>,
    %c0_43 = arith.constant 0 : index
    %c0_44 = arith.constant 0 : index
    %c8_45 = arith.constant 8 : index
    %c0_46 = arith.constant 0 : index
    %45 = vector.load %arg3[%c0_43, %c0_44, %c8_45, %c0_46] : memref<1x4x16x16xf32, #tpu.memory_space<vmem>>, vector<1x4x8x8xf32>
    %46 = vector.shape_cast %45 : vector<1x4x8x8xf32> to vector<4x8x8xf32>
    %cst_47 = arith.constant dense<0xFF800000> : vector<4x8xf32>
    %47 = vector.multi_reduction <maximumf>, %46, %cst_47 [2] : vector<4x8x8xf32> to vector<4x8xf32>
    %cst_48 = arith.constant dense<0xFF800000> : vector<4xf32>
    %48 = vector.multi_reduction <maximumf>, %47, %cst_48 [1] : vector<4x8xf32> to vector<4xf32>
    %c2_49 = arith.constant 2 : index
    %c0_50 = arith.constant 0 : index
    %49 = vector.load %arg6[%c2_49, %c0_50] : memref<4x4xf32, #tpu.memory_space<vmem>>, vector<1x4xf32>
    %50 = vector.shape_cast %49 : vector<1x4xf32> to vector<4xf32>
    %51 = vector.shape_cast %48 : vector<4xf32> to vector<1x4xf32>
    tpu.vector_store %arg6[%c2_49, %c0_50], %51 {strides = array<i32>} : memref<4x4xf32, #tpu.memory_space<vmem>>, vector<1x4xf32>,
    %c0_51 = arith.constant 0 : index
    %c0_52 = arith.constant 0 : index
    %c8_53 = arith.constant 8 : index
    %c8_54 = arith.constant 8 : index
    %52 = vector.load %arg3[%c0_51, %c0_52, %c8_53, %c8_54] : memref<1x4x16x16xf32, #tpu.memory_space<vmem>>, vector<1x4x8x8xf32>
    %53 = vector.shape_cast %52 : vector<1x4x8x8xf32> to vector<4x8x8xf32>
    %cst_55 = arith.constant dense<0xFF800000> : vector<4x8xf32>
    %54 = vector.multi_reduction <maximumf>, %53, %cst_55 [2] : vector<4x8x8xf32> to vector<4x8xf32>
    %cst_56 = arith.constant dense<0xFF800000> : vector<4xf32>
    %55 = vector.multi_reduction <maximumf>, %54, %cst_56 [1] : vector<4x8xf32> to vector<4xf32>
    %c3_57 = arith.constant 3 : index
    %c0_58 = arith.constant 0 : index
    %56 = vector.load %arg6[%c3_57, %c0_58] : memref<4x4xf32, #tpu.memory_space<vmem>>, vector<1x4xf32>
    %57 = vector.shape_cast %56 : vector<1x4xf32> to vector<4xf32>
    %58 = vector.shape_cast %55 : vector<4xf32> to vector<1x4xf32>
    tpu.vector_store %arg6[%c3_57, %c0_58], %58 {strides = array<i32>} : memref<4x4xf32, #tpu.memory_space<vmem>>, vector<1x4xf32>,
    %c0_59 = arith.constant 0 : index
    %c0_60 = arith.constant 0 : index
    %59 = vector.load %arg5[%c0_59, %c0_60] : memref<4x4xf32, #tpu.memory_space<vmem>>, vector<4x4xf32>
    %c0_61 = arith.constant 0 : index
    %c0_62 = arith.constant 0 : index
    %60 = vector.load %arg6[%c0_61, %c0_62] : memref<4x4xf32, #tpu.memory_space<vmem>>, vector<4x4xf32>
    %c0_63 = arith.constant 0 : index
    %c0_64 = arith.constant 0 : index
    %61 = vector.load %arg7[%c0_63, %c0_64] : memref<4x4xf32, #tpu.memory_space<vmem>>, vector<4x4xf32>
    %cst_65 = arith.constant dense<0.000000e+00> : vector<4x4xf32>
    %62 = tpu.matmul %59, %59, %cst_65 {dimension_numbers = #tpu.dot_dimension_numbers<[1], [1], [0], [0], [0, 0, 1, 0], [], []>} : vector<4x4xf32>, vector<4x4xf32>, vector<4x4xf32> -> vector<4x4xf32>
    %63 = arith.addf %61, %62 : vector<4x4xf32>
    %c0_66 = arith.constant 0 : index
    %c0_67 = arith.constant 0 : index
    %64 = vector.load %arg7[%c0_66, %c0_67] : memref<4x4xf32, #tpu.memory_space<vmem>>, vector<4x4xf32>
    tpu.vector_store %arg7[%c0_66, %c0_67], %63 {strides = array<i32>} : memref<4x4xf32, #tpu.memory_space<vmem>>, vector<4x4xf32>,
    %c0_68 = arith.constant 0 : index
    %c0_69 = arith.constant 0 : index
    %65 = vector.load %arg8[%c0_68, %c0_69] : memref<4x4xf32, #tpu.memory_space<vmem>>, vector<4x4xf32>
    %cst_70 = arith.constant dense<0.000000e+00> : vector<4x4xf32>
    %66 = tpu.matmul %60, %60, %cst_70 {dimension_numbers = #tpu.dot_dimension_numbers<[1], [1], [0], [0], [0, 0, 1, 0], [], []>} : vector<4x4xf32>, vector<4x4xf32>, vector<4x4xf32> -> vector<4x4xf32>
    %67 = arith.addf %65, %66 : vector<4x4xf32>
    %c0_71 = arith.constant 0 : index
    %c0_72 = arith.constant 0 : index
    %68 = vector.load %arg8[%c0_71, %c0_72] : memref<4x4xf32, #tpu.memory_space<vmem>>, vector<4x4xf32>
    tpu.vector_store %arg8[%c0_71, %c0_72], %67 {strides = array<i32>} : memref<4x4xf32, #tpu.memory_space<vmem>>, vector<4x4xf32>,
    %c0_i32_73 = arith.constant 0 : i32
    %69 = arith.cmpi eq, %arg1, %c0_i32_73 : i32
    %70 = arith.extui %69 : i1 to i32
    %c0_i32_74 = arith.constant 0 : i32
    %71 = arith.cmpi ne, %70, %c0_i32_74 : i32
    scf.if %71 {
      %c0_75 = arith.constant 0 : index
      %c0_76 = arith.constant 0 : index
      %72 = vector.load %arg7[%c0_75, %c0_76] : memref<4x4xf32, #tpu.memory_space<vmem>>, vector<4x4xf32>
      %c0_77 = arith.constant 0 : index
      %c0_78 = arith.constant 0 : index
      %73 = vector.load %arg8[%c0_77, %c0_78] : memref<4x4xf32, #tpu.memory_space<vmem>>, vector<4x4xf32>
      %74 = tpu.iota {dimensions = array<i32: 0>} : vector<4x4xi32>
      %75 = tpu.iota {dimensions = array<i32: 1>} : vector<4x4xi32>
      %76 = arith.cmpi eq, %74, %75 : vector<4x4xi32>
      %77 = arith.extui %76 : vector<4x4xi1> to vector<4x4xi32>
      %78 = arith.sitofp %77 : vector<4x4xi32> to vector<4x4xf32>
      %79 = arith.mulf %72, %78 : vector<4x4xf32>
      %cst_79 = arith.constant dense<0.000000e+00> : vector<4xf32>
      %80 = vector.multi_reduction <add>, %79, %cst_79 [1] : vector<4x4xf32> to vector<4xf32>
      %81 = math.sqrt %80 : vector<4xf32>
      %cst_80 = arith.constant 9.99999993E-9 : f32
      %82 = vector.broadcast %cst_80 : f32 to vector<4xf32>
      %83 = arith.addf %81, %82 : vector<4xf32>
      %cst_81 = arith.constant 1.000000e+00 : f32
      %84 = vector.broadcast %cst_81 : f32 to vector<4xf32>
      %85 = arith.divf %84, %83 : vector<4xf32>
      %86 = arith.mulf %73, %78 : vector<4x4xf32>
      %cst_82 = arith.constant dense<0.000000e+00> : vector<4xf32>
      %87 = vector.multi_reduction <add>, %86, %cst_82 [1] : vector<4x4xf32> to vector<4xf32>
      %88 = math.sqrt %87 : vector<4xf32>
      %cst_83 = arith.constant 9.99999993E-9 : f32
      %89 = vector.broadcast %cst_83 : f32 to vector<4xf32>
      %90 = arith.addf %88, %89 : vector<4xf32>
      %cst_84 = arith.constant 1.000000e+00 : f32
      %91 = vector.broadcast %cst_84 : f32 to vector<4xf32>
      %92 = arith.divf %91, %90 : vector<4xf32>
      %93 = vector.shape_cast %85 : vector<4xf32> to vector<4x1xf32>
      %94 = vector.broadcast %93 : vector<4x1xf32> to vector<4x4xf32>
      %95 = arith.mulf %72, %94 : vector<4x4xf32>
      %96 = vector.shape_cast %85 : vector<4xf32> to vector<1x4xf32>
      %97 = vector.broadcast %96 : vector<1x4xf32> to vector<4x4xf32>
      %98 = arith.mulf %95, %97 : vector<4x4xf32>
      %99 = vector.shape_cast %92 : vector<4xf32> to vector<4x1xf32>
      %100 = vector.broadcast %99 : vector<4x1xf32> to vector<4x4xf32>
      %101 = arith.mulf %73, %100 : vector<4x4xf32>
      %102 = vector.shape_cast %92 : vector<4xf32> to vector<1x4xf32>
      %103 = vector.broadcast %102 : vector<1x4xf32> to vector<4x4xf32>
      %104 = arith.mulf %101, %103 : vector<4x4xf32>
      %105 = arith.subf %104, %98 : vector<4x4xf32>
      %106 = arith.mulf %105, %105 : vector<4x4xf32>
      %107 = vector.shape_cast %106 : vector<4x4xf32> to vector<1x4x4xf32>
      %cst_85 = arith.constant dense<0.000000e+00> : vector<1xf32>
      %108 = vector.multi_reduction <add>, %107, %cst_85 [1, 2] : vector<1x4x4xf32> to vector<1xf32>
      %109 = vector.shape_cast %108 : vector<1xf32> to vector<1x1x1xf32>
      %110 = vector.extract %109[0, 0, 0] : f32 from vector<1x1x1xf32>
      %cst_86 = arith.constant 3.125000e-02 : f32
      %111 = arith.mulf %110, %cst_86 : f32
      %112 = vector.broadcast %111 : f32 to vector<1x1x1xf32>
      %113 = vector.shape_cast %112 : vector<1x1x1xf32> to vector<1x1x1xf32>
      %114 = vector.broadcast %113 : vector<1x1x1xf32> to vector<1x8x128xf32>
      %c0_87 = arith.constant 0 : index
      %c0_88 = arith.constant 0 : index
      %c0_89 = arith.constant 0 : index
      %115 = vector.load %arg4[%c0_87, %c0_88, %c0_89] : memref<1x8x128xf32, #tpu.memory_space<vmem>>, vector<1x8x128xf32>
      tpu.vector_store %arg4[%c0_87, %c0_88, %c0_89], %114 {strides = array<i32>} : memref<1x8x128xf32, #tpu.memory_space<vmem>>, vector<1x8x128xf32>,
    } else {
    }
    return
  }
  func.func @transform_0(%arg0: i32, %arg1: i32) -> (i32, i32, i32, i32) {
    %c0_i32 = arith.constant 0 : i32
    %c0_i32_0 = arith.constant 0 : i32
    %c0_i32_1 = arith.constant 0 : i32
    return %arg0, %arg1, %c0_i32, %c0_i32_0 : i32, i32, i32, i32
  }
  func.func @transform_1(%arg0: i32, %arg1: i32) -> (i32, i32, i32, i32) {
    %c0_i32 = arith.constant 0 : i32
    %c0_i32_0 = arith.constant 0 : i32
    %c0_i32_1 = arith.constant 0 : i32
    return %arg0, %arg1, %c0_i32, %c0_i32_0 : i32, i32, i32, i32
  }
  func.func @transform_2(%arg0: i32, %arg1: i32) -> (i32, i32, i32) {
    %c0_i32 = arith.constant 0 : i32
    %c0_i32_0 = arith.constant 0 : i32
    %c0_i32_1 = arith.constant 0 : i32
    return %arg0, %c0_i32, %c0_i32_0 : i32, i32, i32
  }
}

</mosaic_0001>

<bundles_post_ra>
// kernel: tpu_custom_call.1
= control target key start
LH: loop header
LB: loop body
LE: loop exit
PB: predicated region body
PF: predicated region fallthrough
CT: control target
= control target key end

     0   :  { %7 = vsyncpa [#allocation7], 0  ;;  %s1631_s0 = inlined_call_operand.hbm [shape: f32[2,4,16,16], index: 0, kind: input, shape index: {}]   ;;  %s1632_s1 = inlined_call_operand.hbm [shape: f32[2,4,16,16], index: 1, kind: input, shape index: {}]   ;;  %s1633_s2 = inlined_call_operand.hbm [shape: f32[2,8,128], index: 2, kind: output, shape index: {}]  }
   0x1   :  { %9 = vsyncpa [#allocation7 + $0x1], 0 }
   0x2   :  { %10 = vsyncpa [#allocation10], 0 }
   0x3   :  { %12 = vsyncpa [#allocation10 + $0x1], 0 }
   0x4   :  { %13 = vsyncpa [#allocation8], 0 }
   0x5   :  { %15 = vsyncpa [#allocation8 + $0x1], 0  ;;  %s1276_s9 = smov 0   ;;  %s1278_s10 = smov 0  }
   0x6   :  { %s1280_s11 = smov 0   ;;  %s1282_s12 = smov 0  }
   0x7   :  { %s1284_s13 = smov 0   ;;  %s1286_s14 = smov 0  }
   0x8 LB: > { %s992_s15 = sadd.s32 4294967295, %s1252_s14   ;;  %s993_s16 = sadd.s32 4294967294, %s1252_s14   ;;  %s1252_s14 = sphi %s1286_s14, %s21_s14   ;;  %s1248_s13 = sphi %s1284_s13, %s1644_s13   ;;  %s1244_s12 = sphi %s1282_s12, %s1643_s12   ;;  %s1240_s11 = sphi %s1280_s11, %s1642_s11   ;;  %s1236_s10 = sphi %s1278_s10, %s1641_s10   ;;  %s1232_s9 = sphi %s1276_s9, %s1640_s9  }
   0x9   : > { %s33_s17 = sadd.s32 1, %s1248_s13  ;;  %s42_s18 = sadd.s32 1, %s1240_s11 }
   0xa   : > { %p35_p0 = scmp.ge.s32.totalorder %s33_s17, 2  ;;  %p49_p1 = scmp.ne.s32.totalorder %s1240_s11, %s1236_s10 }
   0xb   : > { %p50_p2 = scmp.eq.s32.totalorder %s1252_s14, 0  ;;  %p55_p3 = scmp.ne.s32.totalorder %s1236_s10, %s1232_s9 }
   0xc   : > { %s1646_s17 = smov (%p35_p0, %s33_s17), 0  ;;  %p56_p5 = scmp.eq.s32.totalorder %s992_s15, 0 }
   0xd   : > { %p1317_p4 = por %p50_p2, %p49_p1  ;;  %s37_s20 = ssub.s32 %s1248_s13, %s1646_s17 }
   0xe   : > { %p107_p6 = scmp.eq.s32.totalorder %s992_s15, 1  ;;  %p40_p7 = scmp.eq.s32.totalorder %s37_s20, 0 }
   0xf   : > { %p1323_p8 = por %p56_p5, %p55_p3  ;;  %p113_p10 = scmp.eq.s32.totalorder %s993_s16, 1 }
  0x10   : > { %p1327_p9 = por %p107_p6, %p49_p1  ;;  %p995_p12 = scmp.ge.s32.totalorder %s1252_s14, 2 }
  0x11   : > { %s1332_s23 = scalar_select %p40_p7, %s1240_s11, %s42_s18  }
  0x12   : > { %p1334_p11 = por %p113_p10, %p55_p3  ;;  %p1050_p13 = scmp.lt.s32.totalorder %s1252_s14, 2 }
  0x13   : > { %s1341_s25 = sand.u32 1, %s1240_s11   ;;  %s1015_s27 = sshll.u32 %s1248_s13, 10 }
  0x14   : > { %s996_s26 = sshll.u32 %s1341_s25, 6  ;;  %s146_s30 = scalar_lea.hbm %s1631_s0, %s1015_s27 }
  0x15   : > { %s137_s3 = scalar_lea.vmem [#allocation6], %s996_s26  ;;  %p1354_p0 = pnand %p1050_p13, %p1317_p4 }
  0x16   : > { %s147_s4 = sshll.u32 %s137_s3, 4  ;;  %p1002_p1 = scmp.ge.s32.totalorder %s1252_s14, 1  ;;  %s148_s4 = int_to_ptr.vmem [resolvable:$true] %s147_s4 }
  0x17   : > { %s134_s6 = scalar_lea.sflag [#allocation7], %s1341_s25  ;;  %p1114_p2 = pneg %p1354_p0 }
  0x18   : > { %s1125_s7 = scalar_lea.vmem %s148_s4, 1024  ;;  %s1254_s8 = smov [#allocation6]  }
  0x19   : > { %p1126_p3 = scmp.ne.s32.totalorder %s148_s4, %s1125_s7  ;;  %s1130_s15 = sshll.u32 %s1254_s8, 4  ;;  %s1131_s15 = int_to_ptr.vmem [resolvable:$false] %s1130_s15 }
  0x1a   : > { %s1132_s16 = scalar_lea.vmem %s1131_s15, 2048  ;;  %p1133_p4 = scmp.lt.s32.totalorder %s148_s4, %s1131_s15 }
  0x1b   : > { %p1128_p5 = pnand %p1126_p3, %p1114_p2  ;;  %p1134_p7 = scmp.lt.s32.totalorder %s1132_s16, %s1125_s7 }
  0x1d   : > { %p1129_p6 = pneg %p1128_p5  ;;  %p1135_p10 = por %p1134_p7, %p1133_p4 }
  0x1f   : > { %p1136_p13 = pnand %p1135_p10, %p1129_p6 }
  0x21   : > { %1139 = shalt.err (!%p1136_p13)
}
  0x22   : > { %s1255_s18 = smov 128   ;;  %s1256_s19 = smov 8  }
  0x23   : > { %1042 = dma.hbm_to_vmem [thread:$0]  (!%p1354_p0), %s146_s30, 1024, %s148_s4, %s134_s6, %s1255_s18, %s1255_s18, %s1256_s19  }
  0x24   : > { %p179_p3 = scmp.lt.s32.totalorder %s1252_s14, 3  ;;  %s170_s29 = scalar_lea.hbm %s1632_s1, %s1015_s27 }
  0x25   : > { %s161_s7 = scalar_lea.vmem [#allocation9], %s996_s26  ;;  %s158_s15 = scalar_lea.sflag [#allocation10], %s1341_s25 }
  0x26   : > { %p1375_p5 = pnand %p1002_p1, %p179_p3  ;;  %s171_s8 = sshll.u32 %s161_s7, 4  ;;  %s172_s8 = int_to_ptr.vmem [resolvable:$true] %s171_s8 }
  0x27   : > { %s1153_s16 = scalar_lea.vmem %s172_s8, 1024  ;;  %s1257_s30 = smov [#allocation9]  }
  0x28   : > { %p1154_p6 = scmp.ne.s32.totalorder %s172_s8, %s1153_s16  ;;  %s1158_s4 = sshll.u32 %s1257_s30, 4  ;;  %s1159_s4 = int_to_ptr.vmem [resolvable:$false] %s1158_s4 }
  0x29   : > { %s1160_s27 = scalar_lea.vmem %s1159_s4, 2048  ;;  %p1161_p10 = scmp.lt.s32.totalorder %s172_s8, %s1159_s4 }
  0x2a   : > { %p1156_p4 = pnand %p1154_p6, %p1114_p2  ;;  %p1162_p1 = scmp.lt.s32.totalorder %s1160_s27, %s1153_s16 }
  0x2c   : > { %p1157_p7 = pneg %p1156_p4  ;;  %p1163_p13 = por %p1162_p1, %p1161_p10 }
  0x2e   : > { %p1164_p3 = pnand %p1163_p13, %p1157_p7 }
  0x30   : > { %1167 = shalt.err (!%p1164_p3)
}
  0x31   : > { %1045 = dma.hbm_to_vmem [thread:$0]  (!%p1354_p0), %s170_s29, 1024, %s172_s8, %s158_s15, %s1255_s18, %s1255_s18, %s1256_s19  }
  0x32   : > { %183 = sbr.rel (%p1375_p5) target bundleno = 1016 (0x3f8), region = 28  ;;  %s1390_s25 = sand.u32 (!%p1375_p5), 1, %s1236_s10  }
  0x33   : > { %s1003_s26 = sshll.u32 (!%p1375_p5), %s1390_s25, 6  ;;  %s186_s6 = scalar_lea.sflag (!%p1375_p5), [#allocation7], %s1390_s25 }
  0x34   : > { %s1394_s20 = scalar_lea.vmem (!%p1375_p5), [#allocation6], %s1003_s26 }
  0x37   : > { %1219 = dma.done.wait (%p1323_p8), %s186_s6, 1024  }
  0x38   : > { %1221 = vsyncadd (%p1323_p8), %s186_s6, 4294966272  ;;  %s195_s5 = scalar_lea.sflag [#allocation10], %s1390_s25  ;;  %s1401_s18 = scalar_lea.vmem [#allocation9], %s1003_s26 }
  0x39   : > { %1223 = dma.done.wait (%p1323_p8), %s195_s5, 1024  }
  0x3a   : > { %1225 = vsyncadd (%p1323_p8), %s195_s5, 4294966272  ;;  %vm295_vm0 = vcmask 130112   ;;  %vm237_vm1 = vcmask 64512   ;;  %v291_v0 = vld [vmem:[%s1394_s20] sm:$0xff]  ;;  %v292_v1 = vld [vmem:[%s1394_s20 + $0x10] sm:$0xff]  ;;  %vm272_vm2 = vcmask 1041409  }
  0x3b   : > { %v296_v2 = vsel %vm295_vm0, %v291_v0, -inf  ;;  %v238_v3 = vsel %vm237_vm1, %v291_v0, -inf  ;;  %v299_v4 = vsel %vm295_vm0, %v292_v1, -inf  ;;  %v241_v5 = vsel %vm237_vm1, %v292_v1, -inf  ;;  %v343_v6 = vld [vmem:[%s1394_s20 + $0x18] sm:$0xff]  ;;  %v342_v7 = vld [vmem:[%s1394_s20 + $0x8] sm:$0xff] }
  0x3c   : > { %297 = vmax.xlane.f32.xlu1 %v296_v2  ;;  %239 = vmax.xlane.f32.xlu0 %v238_v3  ;;  %v349_v8 = vsel %vm237_vm1, %v343_v6, -inf  ;;  %v346_v9 = vsel %vm237_vm1, %v342_v7, -inf  ;;  %v399_v10 = vsel %vm295_vm0, %v343_v6, -inf  ;;  %v396_v11 = vsel %vm295_vm0, %v342_v7, -inf  ;;  %v443_v12 = vld [vmem:[%s1401_s18 + $0x10] sm:$0xff]  ;;  %v442_v13 = vld [vmem:[%s1401_s18] sm:$0xff] }
  0x3d   : > { %v449_v14 = vsel %vm237_vm1, %v443_v12, -inf  ;;  %v446_v15 = vsel %vm237_vm1, %v442_v13, -inf  ;;  %v499_v16 = vsel %vm295_vm0, %v443_v12, -inf  ;;  %v496_v17 = vsel %vm295_vm0, %v442_v13, -inf  ;;  %v543_v18 = vld [vmem:[%s1401_s18 + $0x18] sm:$0xff]  ;;  %v542_v19 = vld [vmem:[%s1401_s18 + $0x8] sm:$0xff] }
  0x3e   : > { %v549_v20 = vsel %vm237_vm1, %v543_v18, -inf  ;;  %v546_v21 = vsel %vm237_vm1, %v542_v19, -inf  ;;  %v599_v22 = vsel %vm295_vm0, %v543_v18, -inf  ;;  %v596_v23 = vsel %vm295_vm0, %v542_v19, -inf  ;;  %v293_v24 = vld [vmem:[%s1394_s20 + $0x20] sm:$0xff]  ;;  %v394_v27 = vld [vmem:[%s1394_s20 + $0x28] sm:$0xff] }
  0x3f   : > { %v302_v25 = vsel %vm295_vm0, %v293_v24, -inf  ;;  %v244_v26 = vsel %vm237_vm1, %v293_v24, -inf  ;;  %v402_v28 = vsel %vm295_vm0, %v394_v27, -inf  ;;  %v352_v29 = vsel %vm237_vm1, %v394_v27, -inf  ;;  %v494_v30 = vld [vmem:[%s1401_s18 + $0x20] sm:$0xff]  ;;  %v594_v33 = vld [vmem:[%s1401_s18 + $0x28] sm:$0xff] }
  0x40   : > { %300 = vmax.xlane.f32.xlu1 %v299_v4  ;;  %242 = vmax.xlane.f32.xlu0 %v241_v5  ;;  %v502_v31 = vsel %vm295_vm0, %v494_v30, -inf  ;;  %v452_v32 = vsel %vm237_vm1, %v494_v30, -inf  ;;  %v602_v34 = vsel %vm295_vm0, %v594_v33, -inf  ;;  %v552_v35 = vsel %vm237_vm1, %v594_v33, -inf  ;;  %v294_v36 = vld [vmem:[%s1394_s20 + $0x30] sm:$0xff]  ;;  %v395_v39 = vld [vmem:[%s1394_s20 + $0x38] sm:$0xff] }
  0x41   : > { %v305_v37 = vsel %vm295_vm0, %v294_v36, -inf  ;;  %v247_v38 = vsel %vm237_vm1, %v294_v36, -inf  ;;  %v405_v40 = vsel %vm295_vm0, %v395_v39, -inf  ;;  %v355_v41 = vsel %vm237_vm1, %v395_v39, -inf  ;;  %v495_v42 = vld [vmem:[%s1401_s18 + $0x30] sm:$0xff]  ;;  %v595_v45 = vld [vmem:[%s1401_s18 + $0x38] sm:$0xff] }
  0x42   : > { %v505_v43 = vsel %vm295_vm0, %v495_v42, -inf  ;;  %v455_v44 = vsel %vm237_vm1, %v495_v42, -inf  ;;  %v605_v46 = vsel %vm295_vm0, %v595_v45, -inf  ;;  %v555_v47 = vsel %vm237_vm1, %v595_v45, -inf  ;;  %s1005_s21 = sshll.u32 %s1390_s25, 3  ;;  %s1012_s29 = sshll.u32 %s1244_s12, 7 }
  0x43   : > { %v254_v2 = vlaneseq  ;;  %vm274_vm3 = vcmask 1042434   ;;  %vm276_vm4 = vcmask 1043459   ;;  %vm279_vm5 = vcmask 60416   ;;  %s223_s19 = scalar_lea.vmem [#allocation11], %s1005_s21  ;;  %s1589_s16 = scalar_lea.hbm %s1633_s2, %s1012_s29 }
  0x44   : > { %350 = vmax.xlane.f32.xlu1 %v349_v8  ;;  %347 = vmax.xlane.f32.xlu0 %v346_v9  ;;  %vm1259_vm6 = vmmov 0   ;;  %vm230_vm7 = vcmask 27648   ;;  %vm289_vm8 = vcmask 24576   ;;  %vm645_vm9 = vcmask 31744   ;;  %s885_s28 = sshll.u32 %s223_s19, 4  ;;  %s872_s30 = scalar_lea.sflag [#allocation8], %s1390_s25  ;;  %s886_s28 = int_to_ptr.vmem [resolvable:$true] %s885_s28 }
  0x45   : > { %v1467_v5 = vand.u32 127, %v254_v2  ;;  %v1469_v6 = vshrl.u32 %v254_v2, 7  ;;  %s1168_s4 = scalar_lea.vmem %s886_s28, 128  ;;  %s1260_s27 = smov [#allocation11]  }
  0x46   : > { %p1169_p8 = scmp.ne.s32.totalorder %s886_s28, %s1168_s4  ;;  %s1172_s26 = sshll.u32 %s1260_s27, 4  ;;  %s1173_s26 = int_to_ptr.vmem [resolvable:$false] %s1172_s26 }
  0x47   : > { %v1477_v9 = vsub.s32 %v1467_v5, %v1469_v6  ;;  %vm805_vm10 = vcmp.eq.s32.totalorder %v1469_v6, %v1467_v5  ;;  %s1174_s12 = scalar_lea.vmem %s1173_s26, 256  ;;  %p1175_p5 = scmp.lt.s32.totalorder %s886_s28, %s1173_s26 }
  0x48   : > { %400 = vmax.xlane.f32.xlu1 %v399_v10  ;;  %397 = vmax.xlane.f32.xlu0 %v396_v11  ;;  %p1170_p0 = pnand %p1169_p8, %p1327_p9  ;;  %p1176_p6 = scmp.lt.s32.totalorder %s1174_s12, %s1168_s4 }
  0x4a   : > { %p1171_p2 = pneg %p1170_p0  ;;  %p1177_p4 = por %p1176_p6, %p1175_p5 }
  0x4c   : > { %450 = vmax.xlane.f32.xlu1 %v449_v14  ;;  %447 = vmax.xlane.f32.xlu0 %v446_v15  ;;  %p1178_p7 = pnand %p1177_p4, %p1171_p2 }
  0x50   : > { %500 = vmax.xlane.f32.xlu1 %v499_v16  ;;  %497 = vmax.xlane.f32.xlu0 %v496_v17 }
  0x54   : > { %550 = vmax.xlane.f32.xlu1 %v549_v20  ;;  %547 = vmax.xlane.f32.xlu0 %v546_v21 }
  0x58   : > { %600 = vmax.xlane.f32.xlu1 %v599_v22  ;;  %597 = vmax.xlane.f32.xlu0 %v596_v23 }
  0x5c   : > { %303 = vmax.xlane.f32.xlu1 %v302_v25  ;;  %245 = vmax.xlane.f32.xlu0 %v244_v26 }
  0x60   : > { %403 = vmax.xlane.f32.xlu1 %v402_v28  ;;  %353 = vmax.xlane.f32.xlu0 %v352_v29 }
  0x64   : > { %503 = vmax.xlane.f32.xlu1 %v502_v31  ;;  %453 = vmax.xlane.f32.xlu0 %v452_v32 }
  0x68   : > { %603 = vmax.xlane.f32.xlu1 %v602_v34  ;;  %553 = vmax.xlane.f32.xlu0 %v552_v35 }
  0x6c   : > { %306 = vmax.xlane.f32.xlu1 %v305_v37  ;;  %248 = vmax.xlane.f32.xlu0 %v247_v38 }
  0x70   : > { %406 = vmax.xlane.f32.xlu1 %v405_v40  ;;  %356 = vmax.xlane.f32.xlu0 %v355_v41 }
  0x74   : > { %506 = vmax.xlane.f32.xlu1 %v505_v43  ;;  %456 = vmax.xlane.f32.xlu0 %v455_v44 }
  0x78   : > { %606 = vmax.xlane.f32.xlu1 %v605_v46  ;;  %556 = vmax.xlane.f32.xlu0 %v555_v47 }
  0xc5   : > { %v298_v48 = vpop.xlane.xlu1 %297  ;;  %v240_v49 = vpop.xlane.xlu0 %239 }
  0xc6   : > { %v315_v14 = vrot.slane %v298_v48, %v1477_v9  ;;  %v259_v15 = vrot.slane %v240_v49, %v1477_v9 }
  0xc9   : > { %v301_v50 = vpop.xlane.xlu1 %300  ;;  %v243_v51 = vpop.xlane.xlu0 %242 }
  0xca   : > { %v319_v10 = vrot.slane %v301_v50, %v1477_v9  ;;  %v263_v11 = vrot.slane %v243_v51, %v1477_v9 }
  0xcc   : > { %v328_v18 = vsel %vm272_vm2, %v319_v10, %v315_v14  ;;  %v273_v19 = vsel %vm272_vm2, %v263_v11, %v259_v15 }
  0xcd   : > { %v351_v52 = vpop.xlane.xlu1 %350  ;;  %v348_v53 = vpop.xlane.xlu0 %347 }
  0xce   : > { %v369_v20 = vrot.slane %v351_v52, %v1477_v9  ;;  %v365_v21 = vrot.slane %v348_v53, %v1477_v9 }
  0xd0   : > { %v378_v38 = vsel %vm272_vm2, %v369_v20, %v365_v21 }
  0xd1   : > { %v401_v54 = vpop.xlane.xlu1 %400  ;;  %v398_v55 = vpop.xlane.xlu0 %397 }
  0xd2   : > { %v419_v22 = vrot.slane %v401_v54, %v1477_v9  ;;  %v415_v23 = vrot.slane %v398_v55, %v1477_v9 }
  0xd4   : > { %v428_v39 = vsel %vm272_vm2, %v419_v22, %v415_v23  ;;  %v1258_v23 = vmov 0.0  }
  0xd5   : > { %v451_v56 = vpop.xlane.xlu1 %450  ;;  %v448_v57 = vpop.xlane.xlu0 %447  ;;  %1021 = vmatprep.subr.mxu0 %v1258_v23  ;;  %1026 = vmatprep.subr.mxu1 %v1258_v23  ;;  %231 = vst.msk [vmem:[#allocation4] sm:$0xf] %vm230_vm7, %v1258_v23  ;;  %232 = vst.msk [vmem:[#allocation5] sm:$0xf] %vm230_vm7, %v1258_v23 }
  0xd6   : > { %v469_v26 = vrot.slane %v451_v56, %v1477_v9  ;;  %v465_v27 = vrot.slane %v448_v57, %v1477_v9  ;;  %1023 = vmatprep.mubr.msk.f32.mxu0 %vm1259_vm6, %v1258_v23  ;;  %1028 = vmatprep.mubr.msk.f32.mxu1 %vm1259_vm6, %v1258_v23 }
  0xd8   : > { %v478_v44 = vsel %vm272_vm2, %v469_v26, %v465_v27 }
  0xd9   : > { %v1455_v58 = vpop.xlane.xlu1 %500  ;;  %v1457_v59 = vpop.xlane.xlu0 %497 }
  0xda   : > { %v519_v34 = vrot.slane %v1455_v58, %v1477_v9  ;;  %v515_v35 = vrot.slane %v1457_v59, %v1477_v9 }
  0xdc   : > { %v528_v51 = vsel %vm272_vm2, %v519_v34, %v515_v35 }
  0xdd   : > { %v1459_v60 = vpop.xlane.xlu1 %550  ;;  %v1461_v61 = vpop.xlane.xlu0 %547 }
  0xde   : > { %v569_v52 = vrot.slane %v1459_v60, %v1477_v9  ;;  %v565_v55 = vrot.slane %v1461_v61, %v1477_v9 }
  0xe1   : > { %v1463_v62 = vpop.xlane.xlu1 %600  ;;  %v1465_v63 = vpop.xlane.xlu0 %597 }
  0xe2   : > { %v619_v56 = vrot.slane %v1463_v62, %v1477_v9 }
  0xe5   : > { %v304_v0 = vpop.xlane.xlu1 %303  ;;  %v246_v1 = vpop.xlane.xlu0 %245 }
  0xe6   : > { %v323_v16 = vrot.slane %v304_v0, %v1477_v9  ;;  %v267_v17 = vrot.slane %v246_v1, %v1477_v9  ;;  %v615_v1 = vrot.slane %v1465_v63, %v1477_v9 }
  0xe8   : > { %v329_v32 = vsel %vm274_vm3, %v323_v16, %v328_v18  ;;  %v275_v33 = vsel %vm274_vm3, %v267_v17, %v273_v19 }
  0xe9   : > { %v404_v3 = vpop.xlane.xlu1 %403  ;;  %v354_v4 = vpop.xlane.xlu0 %353 }
  0xea   : > { %v423_v30 = vrot.slane %v404_v3, %v1477_v9  ;;  %v373_v31 = vrot.slane %v354_v4, %v1477_v9 }
  0xec   : > { %v429_v49 = vsel %vm274_vm3, %v423_v30, %v428_v39  ;;  %v379_v50 = vsel %vm274_vm3, %v373_v31, %v378_v38 }
  0xed   : > { %v1471_v7 = vpop.xlane.xlu1 %503  ;;  %v1473_v8 = vpop.xlane.xlu0 %453 }
  0xee   : > { %v523_v47 = vrot.slane %v1471_v7, %v1477_v9  ;;  %v473_v48 = vrot.slane %v1473_v8, %v1477_v9  ;;  %v578_v8 = vsel %vm272_vm2, %v569_v52, %v565_v55 }
  0xf0   : > { %v529_v3 = vsel %vm274_vm3, %v523_v47, %v528_v51  ;;  %v479_v4 = vsel %vm274_vm3, %v473_v48, %v478_v44  ;;  %v1010_v48 = vsel %vm805_vm10, 1.0, %v1258_v23 }
  0xf1   : > { %v1481_v12 = vpop.xlane.xlu1 %603  ;;  %v1483_v13 = vpop.xlane.xlu0 %553 }
  0xf2   : > { %v623_v61 = vrot.slane %v1481_v12, %v1477_v9  ;;  %v573_v62 = vrot.slane %v1483_v13, %v1477_v9  ;;  %v628_v12 = vsel %vm272_vm2, %v619_v56, %v615_v1 }
  0xf4   : > { %v629_v17 = vsel %vm274_vm3, %v623_v61, %v628_v12  ;;  %v579_v18 = vsel %vm274_vm3, %v573_v62, %v578_v8 }
  0xf5   : > { %v307_v24 = vpop.xlane.xlu1 %306  ;;  %v249_v25 = vpop.xlane.xlu0 %248 }
  0xf6   : > { %v327_v28 = vrot.slane %v307_v24, %v1477_v9  ;;  %v271_v29 = vrot.slane %v249_v25, %v1477_v9 }
  0xf8   : > { %v330_v36 = vsel %vm276_vm4, %v327_v28, %v329_v32  ;;  %v277_v37 = vsel %vm276_vm4, %v271_v29, %v275_v33 }
  0xf9   : > { %v407_v40 = vpop.xlane.xlu1 %406  ;;  %v357_v41 = vpop.xlane.xlu0 %356  ;;  %v332_v42 = vsel %vm279_vm5, %v330_v36, -inf  ;;  %v280_v43 = vsel %vm279_vm5, %v277_v37, -inf }
  0xfa   : > { %v427_v45 = vrot.slane %v407_v40, %v1477_v9  ;;  %v377_v46 = vrot.slane %v357_v41, %v1477_v9  ;;  %333 = vmax.xlane.f32.xlu1 %v332_v42  ;;  %281 = vmax.xlane.f32.xlu0 %v280_v43  ;;  %v644_v42 = vld [vmem:[#allocation4] sm:$0xf] }
  0xfc   : > { %v430_v53 = vsel %vm276_vm4, %v427_v45, %v429_v49  ;;  %v380_v54 = vsel %vm276_vm4, %v377_v46, %v379_v50  ;;  %v722_v46 = vld [vmem:[#allocation5] sm:$0xf] }
  0xfd   : > { %v507_v57 = vpop.xlane.xlu1 %506  ;;  %v457_v58 = vpop.xlane.xlu0 %456  ;;  %v432_v59 = vsel %vm279_vm5, %v430_v53, -inf  ;;  %v382_v0 = vsel %vm279_vm5, %v380_v54, -inf }
  0xfe   : > { %v527_v60 = vrot.slane %v507_v57, %v1477_v9  ;;  %v477_v2 = vrot.slane %v457_v58, %v1477_v9  ;;  %433 = vmax.xlane.f32.xlu1 %v432_v59  ;;  %383 = vmax.xlane.f32.xlu0 %v382_v0 }
 0x100   : > { %v530_v7 = vsel %vm276_vm4, %v527_v60, %v529_v3  ;;  %v480_v63 = vsel %vm276_vm4, %v477_v2, %v479_v4 }
 0x101   : > { %v607_v10 = vpop.xlane.xlu1 %606  ;;  %v557_v11 = vpop.xlane.xlu0 %556  ;;  %v532_v14 = vsel %vm279_vm5, %v530_v7, -inf  ;;  %v482_v15 = vsel %vm279_vm5, %v480_v63, -inf }
 0x102   : > { %v627_v13 = vrot.slane %v607_v10, %v1477_v9  ;;  %v577_v16 = vrot.slane %v557_v11, %v1477_v9  ;;  %533 = vmax.xlane.f32.xlu1 %v532_v14  ;;  %483 = vmax.xlane.f32.xlu0 %v482_v15 }
 0x104   : > { %v630_v19 = vsel %vm276_vm4, %v627_v13, %v629_v17  ;;  %v580_v20 = vsel %vm276_vm4, %v577_v16, %v579_v18 }
 0x105   : > { %v632_v21 = vsel %vm279_vm5, %v630_v19, -inf  ;;  %v582_v22 = vsel %vm279_vm5, %v580_v20, -inf }
 0x106   : > { %633 = vmax.xlane.f32.xlu1 %v632_v21  ;;  %583 = vmax.xlane.f32.xlu0 %v582_v22 }
 0x183   : > { %v334_v24 = vpop.xlane.xlu1 %333  ;;  %v282_v25 = vpop.xlane.xlu0 %281 }
 0x184   : > { %v339_v26 = vrot.slane %v334_v24, %v1477_v9  ;;  %v287_v27 = vrot.slane %v282_v25, %v1477_v9 }
 0x186   : > { %341 = vst.msk [vmem:[#allocation2 + $0x1] sm:$0x1] %vm289_vm8, %v339_v26  ;;  %290 = vst.msk [vmem:[#allocation2] sm:$0x1] %vm289_vm8, %v287_v27 }
 0x187   : > { %v434_v28 = vpop.xlane.xlu1 %433  ;;  %v384_v29 = vpop.xlane.xlu0 %383 }
 0x188   : > { %v439_v30 = vrot.slane %v434_v28, %v1477_v9  ;;  %v389_v31 = vrot.slane %v384_v29, %v1477_v9 }
 0x18a   : > { %441 = vst.msk [vmem:[#allocation2 + $0x3] sm:$0x1] %vm289_vm8, %v439_v30  ;;  %391 = vst.msk [vmem:[#allocation2 + $0x2] sm:$0x1] %vm289_vm8, %v389_v31 }
 0x18b   : > { %v534_v32 = vpop.xlane.xlu1 %533  ;;  %v484_v33 = vpop.xlane.xlu0 %483 }
 0x18c   : > { %v539_v34 = vrot.slane %v534_v32, %v1477_v9  ;;  %v489_v35 = vrot.slane %v484_v33, %v1477_v9 }
 0x18e   : > { %541 = vst.msk [vmem:[#allocation3 + $0x1] sm:$0x1] %vm289_vm8, %v539_v34  ;;  %491 = vst.msk [vmem:[#allocation3] sm:$0x1] %vm289_vm8, %v489_v35 }
 0x18f   : > { %v634_v36 = vpop.xlane.xlu1 %633  ;;  %v584_v37 = vpop.xlane.xlu0 %583 }
 0x190   : > { %v639_v38 = vrot.slane %v634_v36, %v1477_v9  ;;  %v589_v39 = vrot.slane %v584_v37, %v1477_v9 }
 0x191   : > { %v642_v40 = vld [vmem:[#allocation2] sm:$0xf] }
 0x192   : > { %641 = vst.msk [vmem:[#allocation3 + $0x3] sm:$0x1] %vm289_vm8, %v639_v38  ;;  %591 = vst.msk [vmem:[#allocation3 + $0x2] sm:$0x1] %vm289_vm8, %v589_v39  ;;  %1022 = vmatpush3.xpose.msk.msra.mxu0 %vm645_vm9, %v642_v40 }
 0x195   : > { %1024 = vmatmul.mubr.msk.f32.vlgmr.msra.gmra.mxu0 %vm645_vm9, %v642_v40 }
 0x199   : > { %v643_v41 = vld [vmem:[#allocation3] sm:$0xf] }
 0x19a   : > { %1027 = vmatpush3.xpose.msk.msra.mxu1 %vm645_vm9, %v643_v41 }
 0x19d   : > { %1029 = vmatmul.mubr.msk.f32.vlgmr.msra.gmra.mxu1 %vm645_vm9, %v643_v41 }
 0x255   : > { %v715_v43 = vpop.f32.mrf.mxu0 }
 0x256   : > { %v719_v44 = vadd.f32 %v715_v43, %v644_v42 }
 0x257   : > { %v1025_v45 = vpop.f32.mrf.mxu0 }
 0x258   : > { %721 = vst.msk [vmem:[#allocation4] sm:$0xf] %vm230_vm7, %v719_v44 }
 0x25d   : > { %v792_v47 = vpop.f32.mrf.mxu1 }
 0x25e   : > { %v796_v49 = vadd.f32 %v792_v47, %v722_v46 }
 0x25f   : > { %v1030_v50 = vpop.f32.mrf.mxu1  ;;  %v801_v51 = vld [vmem:[#allocation4] sm:$0xf] }
 0x260   : > { %797 = vst.msk [vmem:[#allocation5] sm:$0xf] %vm230_vm7, %v796_v49  ;;  %v808_v52 = vmul.f32 %v1010_v48, %v801_v51 }
 0x262   : > { %v809_v53 = vsel %vm230_vm7, %v808_v52, 0.0 }
 0x263   : > { %810 = vadd.xlane.f32.xlu0 %v809_v53 }
 0x267   : > { %v802_v54 = vld [vmem:[#allocation5] sm:$0xf] }
 0x268   : > { %v822_v55 = vmul.f32 %v1010_v48, %v802_v54 }
 0x26a   : > { %v823_v56 = vsel %vm230_vm7, %v822_v55, 0.0 }
 0x26b   : > { %824 = vadd.xlane.f32.xlu1 %v823_v56 }
 0x2ec   : > { %v811_v57 = vpop.xlane.xlu0 %810 }
 0x2ed   : > { %1104 = vrsqrt.f32 %v811_v57  ;;  %vm814_vm11 = vcmp.eq.f32.partialorder %v811_v57, inf  ;;  %v817_v59 = vand.u32 2147483648, %v811_v57  ;;  %vm816_vm12 = vcmp.eq.f32.partialorder %v811_v57, 0.0 }
 0x2f4   : > { %v825_v5 = vpop.xlane.xlu1 %824 }
 0x2f5   : > { %1106 = vrsqrt.f32 %v825_v5  ;;  %vm828_vm13 = vcmp.eq.f32.partialorder %v825_v5, inf  ;;  %v831_v62 = vand.u32 2147483648, %v825_v5  ;;  %vm830_vm14 = vcmp.eq.f32.partialorder %v825_v5, 0.0 }
 0x2fa   : > { %v1105_v6 = vpop.eup %1104 }
 0x2fb   : > { %v813_v58 = vmul.f32 %v1105_v6, %v811_v57 }
 0x2fd   : > { %v815_v0 = vsel %vm814_vm11, %v811_v57, %v813_v58 }
 0x2fe   : > { %v818_v1 = vsel %vm816_vm12, %v817_v59, %v815_v0 }
 0x2ff   : > { %v819_v60 = vadd.f32 1e-08, %v818_v1 }
 0x301   : > { %1108 = vrcp.f32 %v819_v60 }
 0x302   : > { %v1107_v2 = vpop.eup %1106 }
 0x303   : > { %v827_v61 = vmul.f32 %v1107_v2, %v825_v5 }
 0x305   : > { %v829_v3 = vsel %vm828_vm13, %v825_v5, %v827_v61 }
 0x306   : > { %v832_v4 = vsel %vm830_vm14, %v831_v62, %v829_v3 }
 0x307   : > { %v833_v7 = vadd.f32 1e-08, %v832_v4 }
 0x309   : > { %1110 = vrcp.f32 %v833_v7 }
 0x30e   : > { %v1109_v63 = vpop.eup %1108 }
 0x30f   : > { %v836_v8 = vmul.f32 %v1109_v63, %v801_v51  ;;  %v841_v10 = vrot.slane %v1109_v63, %v1477_v9 }
 0x311   : > { %v845_v12 = vmul.f32 %v841_v10, %v836_v8 }
 0x316   : > { %v1111_v11 = vpop.eup %1110 }
 0x317   : > { %v846_v14 = vmul.f32 %v1111_v11, %v802_v54  ;;  %v851_v15 = vrot.slane %v1111_v11, %v1477_v9 }
 0x319   : > { %v855_v13 = vmul.f32 %v851_v15, %v846_v14 }
 0x31b   : > { %v856_v16 = vsub.f32 %v855_v13, %v845_v12 }
 0x31d   : > { %v857_v17 = vmul.f32 %v856_v16, %v856_v16 }
 0x31f   : > { %v858_v18 = vsel %vm230_vm7, %v857_v17, 0.0 }
 0x320   : > { %859 = vadd.xlane.f32.xlu0 %v858_v18 }
 0x3a9   : > { %v860_v19 = vpop.xlane.xlu0 %859 }
 0x3aa   : > { %v861_v20 = vrot.slane %v860_v19, 4 }
 0x3ac   : > { %v862_v21 = vadd.f32 %v861_v20, %v860_v19 }
 0x3ae   : > { %v863_v22 = vrot.slane %v862_v21, 2 }
 0x3b0   : > { %v864_v23 = vadd.f32 %v863_v22, %v862_v21 }
 0x3b2   : > { %v865_v24 = vrot.slane %v864_v23, 1 }
 0x3b4   : > { %v866_v25 = vadd.f32 %v865_v24, %v864_v23 }
 0x3b6   : > { %1031 = vpush %v866_v25 }
 0x3e7   : > { %s1032_s3 = spop %1031 }
 0x3e8   : > { %s868_s7 = smul.f32 0.03125, %s1032_s3 }
 0x3ea   : > { %v869_v9 = vstv %s868_s7 }
 0x3eb   : > { %870 = vst [vmem:[%s223_s19] sm:$0xff] %v869_v9 }
 0x3ec   : > { %1181 = shalt.err (!%p1178_p7)
}
 0x3ed   : > { %s1182_s6 = scalar_lea.hbm %s1589_s16, 128  ;;  %s1186_s5 = scalar_lea.hbm %s1633_s2, 256 }
 0x3ee   : > { %p1183_p10 = scmp.ne.s32.totalorder %s1589_s16, %s1182_s6  ;;  %p1187_p3 = scmp.lt.s32.totalorder %s1589_s16, %s1633_s2 }
 0x3ef   : > { %p1188_p8 = scmp.lt.s32.totalorder %s1186_s5, %s1182_s6 }
 0x3f0   : > { %p1184_p1 = pnand %p1183_p10, %p1327_p9 }
 0x3f1   : > { %p1189_p0 = por %p1188_p8, %p1187_p3 }
 0x3f2   : > { %p1185_p13 = pneg %p1184_p1 }
 0x3f4   : > { %p1190_p2 = pnand %p1189_p0, %p1185_p13 }
 0x3f6   : > { %1193 = shalt.err (!%p1190_p2)
}
 0x3f7   : > { %1037 = dma.vmem_to_hbm [thread:$0]  (%p1327_p9), %s886_s28, 128, %s1589_s16, %s872_s30  }
 0x3f8 PF: > { %s897_s19 = sand.u32 1, %s1232_s9   ;;  %p1047_p5 = pnand %p995_p12, %p1334_p11 }
 0x3f9   : > { %s898_s29 = scalar_lea.sflag [#allocation8], %s897_s19 }
 0x3fa   : > { %p1048_p6 = pneg %p1047_p5 }
 0x3fc   : > { %1227 = dma.done.wait (%p1048_p6), %s898_s29, 128  }
 0x3fd   : > { %1229 = vsyncadd (%p1048_p6), %s898_s29, 4294967168  ;;  %s21_s14 = sadd.s32 1, %s1252_s14   ;;  %s1640_s9 = smov %s1236_s10 }
 0x3fe   : > { %p18_p4 = scmp.ge.s32.totalorder %s21_s14, 4   ;;  %s1641_s10 = smov %s1240_s11 }
 0x3ff   : > { %s1642_s11 = smov %s1332_s23  ;;  %s1643_s12 = smov %s1248_s13 }
 0x400   : > { %s1644_s13 = smov %s1646_s17  ;;  %20 = sbr.rel (!%p18_p4) target bundleno = 8 (0x8), region = 94 }
 0x405   :  { %903 = vsyncpa [#allocation7], 1 }
 0x406   :  { %905 = vsyncpa [#allocation7 + $0x1], 1 }
 0x407   :  { %906 = vsyncpa [#allocation10], 1 }
 0x408   :  { %908 = vsyncpa [#allocation10 + $0x1], 1 }
 0x409   :  { %909 = vsyncpa [#allocation8], 1 }
 0x40a   :  { %911 = vsyncpa [#allocation8 + $0x1], 1 }

</bundles_post_ra>
